<compile_context>
chip_gen: v7x
topology: tpu7x:2x2x1
jax: 0.10.0
libtpu: 0.0.40
codegen_flags: <defaults>
</compile_context>

<pallas_src>
import functools
import math

import jax
import jax.numpy as jnp
from jax.experimental import pallas as pl
from jax.experimental.pallas import tpu as pltpu

HIDDEN = 128  # fc1/fc2 width; also the padded in-dim and padded fc3 out-dim


def _round_up(x, m):
    return (x + m - 1) // m * m


# ----------------------------------------------------------------------------
# Fused kernel: 3 noisy linear layers + ReLU, one K=256 matmul per layer.
# ----------------------------------------------------------------------------
def noisy_dqn_kernel(x_ref, w_ref, v_ref, out_ref, *, use_bf16=False):
    compute_dtype = jnp.bfloat16 if use_bf16 else jnp.float32

    def noisy_linear(h, li):
        vec = v_ref[li]                      # (2, 128) f32
        b = vec[0:1, :]                      # effective noisy bias (hoisted)
        ei = vec[1:2, :]                     # eps_in, zero-padded to 128
        # W_eff = Wm + Ws*(eps_out (x) eps_in) rank-1 identity, K-stacked:
        #   h @ W_eff.T = [h, h*eps_in] @ [[Wm.T], [Ws.T*eps_out]]
        lhs = jnp.concatenate([h, h * ei], axis=-1)          # (tb, 256)
        w = w_ref[li]                                         # (256, 128)
        y = jnp.dot(lhs.astype(compute_dtype), w.astype(compute_dtype),
                    preferred_element_type=jnp.float32)
        return y + b

    h1 = jnp.maximum(noisy_linear(x_ref[...], 0), 0.0)
    h2 = jnp.maximum(noisy_linear(h1, 1), 0.0)
    out_ref[...] = noisy_linear(h2, 2)


# ----------------------------------------------------------------------------
# Wrapper: feature/batch padding, grid setup; returns (B, num_outputs).
# ----------------------------------------------------------------------------
def noisy_dqn_forward(x, w_all, v_all, num_outputs, use_bf16=False):
    B, num_in = x.shape
    assert num_in <= HIDDEN
    # Lane-dense input: pad feature dim to 128 (matching the zero-padded w1).
    if num_in < HIDDEN:
        x = jnp.pad(x, ((0, 0), (0, HIDDEN - num_in)))

    # Batch tile: multiple of 8 sublanes, up to 256 rows per grid step.
    tb = min(_round_up(B, 8), 256)
    b_pad = _round_up(B, tb)
    if b_pad // tb == 1 and tb > HIDDEN:
        # Split an oversized single tile so the parallel batch axis can shard
        # across both TensorCores (v7x).
        tb = _round_up(b_pad // 2, 8)
        b_pad = _round_up(B, tb)
    if b_pad != B:
        x = jnp.pad(x, ((0, b_pad - B), (0, 0)))
    grid = (b_pad // tb,)

    kernel = functools.partial(noisy_dqn_kernel, use_bf16=use_bf16)

    out = pl.pallas_call(
        kernel,
        out_shape=jax.ShapeDtypeStruct((b_pad, HIDDEN), jnp.float32),
        grid_spec=pltpu.PrefetchScalarGridSpec(
            num_scalar_prefetch=0,
            grid=grid,
            in_specs=[
                pl.BlockSpec((tb, HIDDEN), lambda i: (i, 0)),
                # Packed weights / vectors: constant block index -> stay
                # VMEM-resident across batch-grid steps.
                pl.BlockSpec(w_all.shape, lambda i: (0, 0, 0)),
                pl.BlockSpec(v_all.shape, lambda i: (0, 0, 0)),
            ],
            out_specs=pl.BlockSpec((tb, HIDDEN), lambda i: (i, 0)),
        ),
        compiler_params=pltpu.CompilerParams(
            dimension_semantics=("parallel",)),
    )(x, w_all, v_all)

    return out[:B, :num_outputs]


# ----------------------------------------------------------------------------
# Parameter / noise construction (mirrors NoisyLinear reset_parameters +
# reset_noise) and packing into the kernel layout.
# ----------------------------------------------------------------------------
def scale_noise(key, size):
    v = jax.random.normal(key, (size,), dtype=jnp.float32)
    return jnp.sign(v) * jnp.sqrt(jnp.abs(v))


def make_noisy_linear_params(key, in_features, out_features, std_init=0.4):
    k_wmu, k_bmu, k_ein, k_eout = jax.random.split(key, 4)
    mu_range = 1.0 / math.sqrt(in_features)
    sigma_val = std_init / math.sqrt(in_features)
    return dict(
        weight_mu=jax.random.uniform(
            k_wmu, (out_features, in_features), jnp.float32,
            -mu_range, mu_range),
        weight_sigma=jnp.full((out_features, in_features), sigma_val,
                              jnp.float32),
        bias_mu=jax.random.uniform(
            k_bmu, (out_features,), jnp.float32, -mu_range, mu_range),
        bias_sigma=jnp.full((out_features,), sigma_val, jnp.float32),
        eps_in=scale_noise(k_ein, in_features),
        eps_out=scale_noise(k_eout, out_features),
    )


def pack_params(layers, use_bf16=False):
    """Kernel layout (all per-reset / per-param-update work hoisted here):
       w_all (3, 2*128, 128): per layer, [weight_mu.T ; weight_sigma.T*eps_out]
                              zero-padded to 128x128 each, K-stacked.
       v_all (3, 2, 128):     per layer, [bias_mu + bias_sigma*eps_out, eps_in]
                              zero-padded to 128."""
    H = HIDDEN
    w_list, v_list = [], []
    for p in layers:
        wm_t = p["weight_mu"].T                                   # (in, out)
        ws_t = p["weight_sigma"].T * p["eps_out"][None, :]        # pre-scaled

        def pad2(a):
            return jnp.pad(a, ((0, H - a.shape[0]), (0, H - a.shape[1])))

        def pad1(v):
            return jnp.pad(v, (0, H - v.shape[0]))

        w = jnp.concatenate([pad2(wm_t), pad2(ws_t)], axis=0)     # (2H, H)
        b_eff = p["bias_mu"] + p["bias_sigma"] * p["eps_out"]
        vec = jnp.stack([pad1(b_eff), pad1(p["eps_in"])], axis=0)  # (2, H)
        w_list.append(w)
        v_list.append(vec)

    w_all = jnp.stack(w_list, axis=0)                             # (3, 2H, H)
    v_all = jnp.stack(v_list, axis=0)                             # (3, 2, H)
    if use_bf16:
        w_all = w_all.astype(jnp.bfloat16)
    return w_all, v_all


# ----------------------------------------------------------------------------
# Pure-JAX reference of NoisyDQN.forward (training mode).
# ----------------------------------------------------------------------------
def reference_forward(x, layers):
    h = x
    for idx, p in enumerate(layers):
        w = p["weight_mu"] + p["weight_sigma"] * jnp.outer(p["eps_out"],
                                                           p["eps_in"])
        b = p["bias_mu"] + p["bias_sigma"] * p["eps_out"]
        h = h @ w.T + b
        if idx < len(layers) - 1:
            h = jax.nn.relu(h)
    return h


if __name__ == "__main__":
    num_inputs = 8
    num_outputs = 4
    batch = 2

    root = jax.random.PRNGKey(0)
    k_x, k1, k2, k3 = jax.random.split(root, 4)

    x = jax.random.normal(k_x, (batch, num_inputs), dtype=jnp.float32)

    layers = [
        make_noisy_linear_params(k1, num_inputs, HIDDEN),
        make_noisy_linear_params(k2, HIDDEN, HIDDEN),
        make_noisy_linear_params(k3, HIDDEN, num_outputs),
    ]
    # use_bf16=False keeps exact f32 parity with the PyTorch-matching
    # reference; set True on v6e/v7x for ~2-3x MXU / half the weight bytes.
    w_all, v_all = pack_params(layers, use_bf16=False)

    out = noisy_dqn_forward(x, w_all, v_all, num_outputs, use_bf16=False)
    out = jax.block_until_ready(out)

    ref = reference_forward(x, layers)
    assert out.shape == (batch, num_outputs)
    assert jnp.allclose(out, ref, atol=1e-4, rtol=1e-4), "mismatch vs reference"

    print("KERNEL_OK")
</pallas_src>

<mosaic_0001>
module attributes {stable_mosaic.version = 11 : i64} {
  func.func @noisy_dqn_kernel(%arg0: i32, %arg1: memref<8x128xf32, #tpu.memory_space<vmem>>, %arg2: memref<3x256x128xf32, #tpu.memory_space<vmem>>, %arg3: memref<3x2x128xf32, #tpu.memory_space<vmem>>, %arg4: memref<8x128xf32, #tpu.memory_space<vmem>>) attributes {dimension_semantics = [#tpu.dimension_semantics<parallel>], iteration_bounds = array<i64: 1>, scalar_prefetch = 0 : i64, scratch_operands = 0 : i64, tpu.core_type = #tpu.core_type<tc>, window_params = [{transform_indices = @transform_0, window_bounds = array<i64: 8, 128>}, {pipeline_mode = #tpu.pipeline_mode<synchronous>, transform_indices = @transform_1, window_bounds = array<i64: 3, 256, 128>}, {pipeline_mode = #tpu.pipeline_mode<synchronous>, transform_indices = @transform_2, window_bounds = array<i64: 3, 2, 128>}, {transform_indices = @transform_3, window_bounds = array<i64: 8, 128>}]} {
    %c0 = arith.constant 0 : index
    %c0_0 = arith.constant 0 : index
    %0 = vector.load %arg1[%c0, %c0_0] : memref<8x128xf32, #tpu.memory_space<vmem>>, vector<8x128xf32>
    %c0_1 = arith.constant 0 : index
    %c0_2 = arith.constant 0 : index
    %c0_3 = arith.constant 0 : index
    %1 = vector.load %arg3[%c0_1, %c0_2, %c0_3] : memref<3x2x128xf32, #tpu.memory_space<vmem>>, vector<1x2x128xf32>
    %2 = vector.shape_cast %1 : vector<1x2x128xf32> to vector<2x128xf32>
    %3 = vector.extract_strided_slice %2 {offsets = [0, 0], sizes = [1, 128], strides = [1, 1]} : vector<2x128xf32> to vector<1x128xf32>
    %4 = vector.extract_strided_slice %2 {offsets = [1, 0], sizes = [1, 128], strides = [1, 1]} : vector<2x128xf32> to vector<1x128xf32>
    %5 = vector.broadcast %4 : vector<1x128xf32> to vector<8x128xf32>
    %6 = arith.mulf %0, %5 : vector<8x128xf32>
    %7 = tpu.concatenate %0, %6 in 1 : vector<8x128xf32>, vector<8x128xf32> -> vector<8x256xf32>
    %c0_4 = arith.constant 0 : index
    %c0_5 = arith.constant 0 : index
    %c0_6 = arith.constant 0 : index
    %8 = vector.load %arg2[%c0_4, %c0_5, %c0_6] : memref<3x256x128xf32, #tpu.memory_space<vmem>>, vector<1x256x128xf32>
    %9 = vector.shape_cast %8 : vector<1x256x128xf32> to vector<256x128xf32>
    %cst = arith.constant dense<0.000000e+00> : vector<8x128xf32>
    %10 = tpu.matmul %7, %9, %cst {dimension_numbers = #tpu.dot_dimension_numbers<[1], [0], [0], [1], [0, 0, 1, 1], [], []>} : vector<8x256xf32>, vector<256x128xf32>, vector<8x128xf32> -> vector<8x128xf32>
    %11 = vector.broadcast %3 : vector<1x128xf32> to vector<8x128xf32>
    %12 = arith.addf %10, %11 : vector<8x128xf32>
    %cst_7 = arith.constant 0.000000e+00 : f32
    %13 = vector.broadcast %cst_7 : f32 to vector<8x128xf32>
    %14 = arith.maximumf %12, %13 : vector<8x128xf32>
    %c1 = arith.constant 1 : index
    %c0_8 = arith.constant 0 : index
    %c0_9 = arith.constant 0 : index
    %15 = vector.load %arg3[%c1, %c0_8, %c0_9] : memref<3x2x128xf32, #tpu.memory_space<vmem>>, vector<1x2x128xf32>
    %16 = vector.shape_cast %15 : vector<1x2x128xf32> to vector<2x128xf32>
    %17 = vector.extract_strided_slice %16 {offsets = [0, 0], sizes = [1, 128], strides = [1, 1]} : vector<2x128xf32> to vector<1x128xf32>
    %18 = vector.extract_strided_slice %16 {offsets = [1, 0], sizes = [1, 128], strides = [1, 1]} : vector<2x128xf32> to vector<1x128xf32>
    %19 = vector.broadcast %18 : vector<1x128xf32> to vector<8x128xf32>
    %20 = arith.mulf %14, %19 : vector<8x128xf32>
    %21 = tpu.concatenate %14, %20 in 1 : vector<8x128xf32>, vector<8x128xf32> -> vector<8x256xf32>
    %c1_10 = arith.constant 1 : index
    %c0_11 = arith.constant 0 : index
    %c0_12 = arith.constant 0 : index
    %22 = vector.load %arg2[%c1_10, %c0_11, %c0_12] : memref<3x256x128xf32, #tpu.memory_space<vmem>>, vector<1x256x128xf32>
    %23 = vector.shape_cast %22 : vector<1x256x128xf32> to vector<256x128xf32>
    %cst_13 = arith.constant dense<0.000000e+00> : vector<8x128xf32>
    %24 = tpu.matmul %21, %23, %cst_13 {dimension_numbers = #tpu.dot_dimension_numbers<[1], [0], [0], [1], [0, 0, 1, 1], [], []>} : vector<8x256xf32>, vector<256x128xf32>, vector<8x128xf32> -> vector<8x128xf32>
    %25 = vector.broadcast %17 : vector<1x128xf32> to vector<8x128xf32>
    %26 = arith.addf %24, %25 : vector<8x128xf32>
    %cst_14 = arith.constant 0.000000e+00 : f32
    %27 = vector.broadcast %cst_14 : f32 to vector<8x128xf32>
    %28 = arith.maximumf %26, %27 : vector<8x128xf32>
    %c2 = arith.constant 2 : index
    %c0_15 = arith.constant 0 : index
    %c0_16 = arith.constant 0 : index
    %29 = vector.load %arg3[%c2, %c0_15, %c0_16] : memref<3x2x128xf32, #tpu.memory_space<vmem>>, vector<1x2x128xf32>
    %30 = vector.shape_cast %29 : vector<1x2x128xf32> to vector<2x128xf32>
    %31 = vector.extract_strided_slice %30 {offsets = [0, 0], sizes = [1, 128], strides = [1, 1]} : vector<2x128xf32> to vector<1x128xf32>
    %32 = vector.extract_strided_slice %30 {offsets = [1, 0], sizes = [1, 128], strides = [1, 1]} : vector<2x128xf32> to vector<1x128xf32>
    %33 = vector.broadcast %32 : vector<1x128xf32> to vector<8x128xf32>
    %34 = arith.mulf %28, %33 : vector<8x128xf32>
    %35 = tpu.concatenate %28, %34 in 1 : vector<8x128xf32>, vector<8x128xf32> -> vector<8x256xf32>
    %c2_17 = arith.constant 2 : index
    %c0_18 = arith.constant 0 : index
    %c0_19 = arith.constant 0 : index
    %36 = vector.load %arg2[%c2_17, %c0_18, %c0_19] : memref<3x256x128xf32, #tpu.memory_space<vmem>>, vector<1x256x128xf32>
    %37 = vector.shape_cast %36 : vector<1x256x128xf32> to vector<256x128xf32>
    %cst_20 = arith.constant dense<0.000000e+00> : vector<8x128xf32>
    %38 = tpu.matmul %35, %37, %cst_20 {dimension_numbers = #tpu.dot_dimension_numbers<[1], [0], [0], [1], [0, 0, 1, 1], [], []>} : vector<8x256xf32>, vector<256x128xf32>, vector<8x128xf32> -> vector<8x128xf32>
    %39 = vector.broadcast %31 : vector<1x128xf32> to vector<8x128xf32>
    %40 = arith.addf %38, %39 : vector<8x128xf32>
    %c0_21 = arith.constant 0 : index
    %c0_22 = arith.constant 0 : index
    %41 = vector.load %arg4[%c0_21, %c0_22] : memref<8x128xf32, #tpu.memory_space<vmem>>, vector<8x128xf32>
    tpu.vector_store %arg4[%c0_21, %c0_22], %40 {strides = array<i32>} : memref<8x128xf32, #tpu.memory_space<vmem>>, vector<8x128xf32>,
    return
  }
  func.func @transform_0(%arg0: i32) -> (i32, i32) {
    %c0_i32 = arith.constant 0 : i32
    %c0_i32_0 = arith.constant 0 : i32
    return %arg0, %c0_i32 : i32, i32
  }
  func.func @transform_1(%arg0: i32) -> (i32, i32, i32) {
    %c0_i32 = arith.constant 0 : i32
    %c0_i32_0 = arith.constant 0 : i32
    %c0_i32_1 = arith.constant 0 : i32
    %c0_i32_2 = arith.constant 0 : i32
    return %c0_i32, %c0_i32_0, %c0_i32_1 : i32, i32, i32
  }
  func.func @transform_2(%arg0: i32) -> (i32, i32, i32) {
    %c0_i32 = arith.constant 0 : i32
    %c0_i32_0 = arith.constant 0 : i32
    %c0_i32_1 = arith.constant 0 : i32
    %c0_i32_2 = arith.constant 0 : i32
    return %c0_i32, %c0_i32_0, %c0_i32_1 : i32, i32, i32
  }
  func.func @transform_3(%arg0: i32) -> (i32, i32) {
    %c0_i32 = arith.constant 0 : i32
    %c0_i32_0 = arith.constant 0 : i32
    return %arg0, %c0_i32 : i32, i32
  }
}

</mosaic_0001>

<bundles_post_ra>
// kernel: tpu_custom_call.1
= control target key start
LH: loop header
LB: loop body
LE: loop exit
PB: predicated region body
PF: predicated region fallthrough
CT: control target
= control target key end

     0   :  { %8 = vsyncpa [#allocation3], 0  ;;  %s775_s0 = inlined_call_operand.hbm [shape: f32[8,128], index: 0, kind: input, shape index: {}]   ;;  %s776_s1 = inlined_call_operand.hbm [shape: f32[3,256,128], index: 1, kind: input, shape index: {}]   ;;  %s777_s2 = inlined_call_operand.vmem [shape: f32[3,2,128], index: 2, kind: input, shape index: {}]   ;;  %s778_s3 = inlined_call_operand.hbm [shape: f32[8,128], index: 3, kind: output, shape index: {}]  }
   0x1   :  { %9 = vsyncpa [#allocation6], 0 }
   0x2   :  { %10 = vsyncpa [#allocation4], 0  ;;  %s681_s12 = smov [#allocation2]   ;;  %s682_s14 = smov [#allocation5]  }
   0x3   :  { %s17_s13 = sshll.u32 %s681_s12, 4  ;;  %s26_s15 = sshll.u32 %s682_s14, 4  ;;  %s18_s13 = int_to_ptr.vmem [resolvable:$true] %s17_s13  ;;  %s706_s15 = int_to_ptr.vmem [resolvable:$true] %s26_s15 }
   0x4   :  { %s609_s18 = scalar_lea.hbm %s775_s0, 128 }
   0x5   :  { %p610_p0 = scmp.ne.s32.totalorder %s775_s0, %s609_s18  ;;  %p613_p1 = scmp.lt.u32.totalorder %s609_s18, %s775_s0 }
   0x7   :  { %p615_p2 = pnand %p613_p1, %p610_p0 }
   0x9   :  { %618 = shalt.err (!%p615_p2)
}
   0xa   :  { %s619_s23 = scalar_lea.vmem %s18_s13, 128  ;;  %p624_p4 = scmp.lt.s32.totalorder %s18_s13, %s18_s13 }
   0xb   :  { %p620_p3 = scmp.ne.s32.totalorder %s18_s13, %s619_s23  ;;  %p625_p5 = scmp.lt.s32.totalorder %s619_s23, %s619_s23 }
   0xd   :  { %p626_p6 = por %p625_p5, %p624_p4 }
   0xf   :  { %p627_p7 = pnand %p626_p6, %p620_p3 }
  0x11   :  { %630 = shalt.err (!%p627_p7)
}
  0x12   :  { %20 = dma.hbm_to_vmem [thread:$0]  %s775_s0, 128, %s18_s13, [#allocation3]  }
  0x13   :  { %s631_s28 = scalar_lea.hbm %s776_s1, 12288 }
  0x14   :  { %p632_p8 = scmp.ne.s32.totalorder %s776_s1, %s631_s28  ;;  %p635_p9 = scmp.lt.u32.totalorder %s631_s28, %s776_s1 }
  0x16   :  { %p637_p10 = pnand %p635_p9, %p632_p8 }
  0x18   :  { %640 = shalt.err (!%p637_p10)
}
  0x19   :  { %s641_s6 = scalar_lea.vmem %s706_s15, 12288  ;;  %p646_p12 = scmp.lt.s32.totalorder %s706_s15, %s706_s15 }
  0x1a   :  { %p642_p11 = scmp.ne.s32.totalorder %s706_s15, %s641_s6  ;;  %p647_p13 = scmp.lt.s32.totalorder %s641_s6, %s641_s6 }
  0x1c   :  { %p648_p0 = por %p647_p13, %p646_p12 }
  0x1e   :  { %p649_p1 = pnand %p648_p0, %p642_p11 }
  0x20   :  { %652 = shalt.err (!%p649_p1)
}
  0x21   :  { %s683_s0 = smov 128   ;;  %s684_s7 = smov 8  }
  0x22   :  { %32 = dma.hbm_to_vmem [thread:$0]  %s776_s1, 12288, %s706_s15, [#allocation6], %s683_s0, %s683_s0, %s684_s7  }
  0x23   :  { %675 = dma.done.wait [#allocation3], 128  }
  0x24   :  { %676 = vsyncadd [#allocation3], 4294967168 }
  0x25   :  { %677 = dma.done.wait [#allocation6], 12288  }
  0x26   :  { %678 = vsyncadd [#allocation6], 4294955008  ;;  %v64_v0 = vld [vmem:[#allocation5 + $0x80] sm:$0xff]  ;;  %v65_v1 = vld [vmem:[#allocation5 + $0x88] sm:$0xff]  ;;  %v43_v3 = vlaneseq  ;;  %s685_s15 = smov [#allocation7]  }
  0x27   :  { %v48_v2 = vld [vmem:[#allocation5] sm:$0xff]  ;;  %v508_v4 = vpack.c.bf16 %v65_v1, %v64_v0  ;;  %v49_v5 = vld [vmem:[#allocation5 + $0x8] sm:$0xff]  ;;  %v66_v6 = vld [vmem:[#allocation5 + $0x90] sm:$0xff]  ;;  %s391_s16 = sshll.u32 %s685_s15, 4  ;;  %s392_s16 = int_to_ptr.vmem [resolvable:$true] %s391_s16 }
  0x28   :  { %v67_v7 = vld [vmem:[#allocation5 + $0x98] sm:$0xff]  ;;  %v510_v8 = vpack.c.bf16 %v49_v5, %v48_v2  ;;  %v50_v10 = vld [vmem:[#allocation5 + $0x10] sm:$0xff]  ;;  %v68_v12 = vld [vmem:[#allocation5 + $0xa0] sm:$0xff]  ;;  %v737_v15 = vshrl.u32 %v43_v3, 7  ;;  %s653_s17 = scalar_lea.vmem %s392_s16, 128  ;;  %p658_p3 = scmp.lt.s32.totalorder %s392_s16, %s392_s16 }
  0x29   :  { %v512_v9 = vpack.c.bf16 %v67_v7, %v66_v6  ;;  %v51_v11 = vld [vmem:[#allocation5 + $0x18] sm:$0xff]  ;;  %509 = vmatprep.subr.bf16.mxu0 %v508_v4  ;;  %v69_v13 = vld [vmem:[#allocation5 + $0xa8] sm:$0xff]  ;;  %v52_v17 = vld [vmem:[#allocation5 + $0x20] sm:$0xff]  ;;  %p654_p2 = scmp.ne.s32.totalorder %s392_s16, %s653_s17  ;;  %p659_p4 = scmp.lt.s32.totalorder %s653_s17, %s653_s17 }
  0x2a   :  { %511 = vmatpush3.bf16.msra.mxu0 %v510_v8  ;;  %v514_v14 = vpack.c.bf16 %v51_v11, %v50_v10  ;;  %v516_v16 = vpack.c.bf16 %v69_v13, %v68_v12  ;;  %v53_v18 = vld [vmem:[#allocation5 + $0x28] sm:$0xff]  ;;  %v70_v19 = vld [vmem:[#allocation5 + $0xb0] sm:$0xff]  ;;  %v71_v20 = vld [vmem:[#allocation5 + $0xb8] sm:$0xff]  ;;  %v740_v22 = vsub.s32 1, %v737_v15 }
  0x2b   :  { %513 = vmatprep.subr.bf16.mxu0 %v512_v9  ;;  %v518_v21 = vpack.c.bf16 %v53_v18, %v52_v17  ;;  %v520_v23 = vpack.c.bf16 %v71_v20, %v70_v19  ;;  %v54_v24 = vld [vmem:[#allocation5 + $0x30] sm:$0xff]  ;;  %v55_v25 = vld [vmem:[#allocation5 + $0x38] sm:$0xff]  ;;  %v72_v26 = vld [vmem:[#allocation5 + $0xc0] sm:$0xff]  ;;  %p660_p5 = por %p659_p4, %p658_p3 }
  0x2c   :  { %v73_v27 = vld [vmem:[#allocation5 + $0xc8] sm:$0xff]  ;;  %v742_v28 = vld [vmem:[#allocation2] sm:$0xff]  ;;  %v56_v29 = vld [vmem:[#allocation5 + $0x40] sm:$0xff]  ;;  %v522_v34 = vpack.c.bf16 %v55_v25, %v54_v24 }
  0x2d   :  { %v57_v30 = vld [vmem:[#allocation5 + $0x48] sm:$0xff]  ;;  %v747_v31 = vld [vmem:[%s777_s2] sm:$0x3]  ;;  %v179_v32 = vld [vmem:[#allocation5 + $0x180] sm:$0xff]  ;;  %v524_v41 = vpack.c.bf16 %v73_v27, %v72_v26  ;;  %p661_p6 = pnand %p660_p5, %p654_p2 }
  0x2e   :  { %515 = vmatpush3.bf16.msra.mxu0 %v514_v14  ;;  %v180_v33 = vld [vmem:[#allocation5 + $0x188] sm:$0xff]  ;;  %v74_v35 = vld [vmem:[#allocation5 + $0xd0] sm:$0xff]  ;;  %v46_v36 = vrot.slane %v747_v31, %v740_v22  ;;  %v163_v38 = vld [vmem:[#allocation5 + $0x100] sm:$0xff]  ;;  %v526_v52 = vpack.c.bf16 %v57_v30, %v56_v29 }
  0x2f   :  { %517 = vmatprep.subr.bf16.mxu0 %v516_v16  ;;  %v540_v37 = vpack.c.bf16 %v180_v33, %v179_v32  ;;  %v164_v39 = vld [vmem:[#allocation5 + $0x108] sm:$0xff]  ;;  %v181_v40 = vld [vmem:[#allocation5 + $0x190] sm:$0xff]  ;;  %v182_v43 = vld [vmem:[#allocation5 + $0x198] sm:$0xff] }
  0x30   :  { %v542_v42 = vpack.c.bf16 %v164_v39, %v163_v38  ;;  %v165_v44 = vld [vmem:[#allocation5 + $0x110] sm:$0xff]  ;;  %v166_v45 = vld [vmem:[#allocation5 + $0x118] sm:$0xff]  ;;  %v47_v47 = vmul.f32 %v46_v36, %v742_v28  ;;  %v544_v48 = vpack.c.bf16 %v182_v43, %v181_v40  ;;  %v183_v49 = vld [vmem:[#allocation5 + $0x1a0] sm:$0xff] }
  0x31   :  { %v75_v46 = vld [vmem:[#allocation5 + $0xd8] sm:$0xff]  ;;  %541 = vmatprep.subr.bf16.mxu1 %v540_v37  ;;  %v184_v50 = vld [vmem:[#allocation5 + $0x1a8] sm:$0xff]  ;;  %v546_v51 = vpack.c.bf16 %v166_v45, %v165_v44  ;;  %v58_v53 = vld [vmem:[#allocation5 + $0x50] sm:$0xff] }
  0x32   :  { %519 = vmatpush3.bf16.msra.mxu0 %v518_v21  ;;  %543 = vmatpush3.bf16.msra.mxu1 %v542_v42  ;;  %v548_v54 = vpack.c.bf16 %v184_v50, %v183_v49  ;;  %v167_v55 = vld [vmem:[#allocation5 + $0x120] sm:$0xff]  ;;  %v168_v56 = vld [vmem:[#allocation5 + $0x128] sm:$0xff]  ;;  %v528_v57 = vpack.c.bf16 %v75_v46, %v74_v35  ;;  %v59_v58 = vld [vmem:[#allocation5 + $0x58] sm:$0xff] }
  0x33   :  { %521 = vmatprep.subr.bf16.mxu0 %v520_v23  ;;  %148 = vmatprep.mubr.f32.mxu0 %v47_v47  ;;  %v185_v59 = vld [vmem:[#allocation5 + $0x1b0] sm:$0xff]  ;;  %v186_v60 = vld [vmem:[#allocation5 + $0x1b8] sm:$0xff]  ;;  %v76_v61 = vld [vmem:[#allocation5 + $0xe0] sm:$0xff]  ;;  %v550_v63 = vpack.c.bf16 %v168_v56, %v167_v55  ;;  %v530_v0 = vpack.c.bf16 %v59_v58, %v58_v53 }
  0x34   :  { %545 = vmatprep.subr.bf16.mxu1 %v544_v48  ;;  %v77_v62 = vld [vmem:[#allocation5 + $0xe8] sm:$0xff]  ;;  %v60_v1 = vld [vmem:[#allocation5 + $0x60] sm:$0xff]  ;;  %v552_v2 = vpack.c.bf16 %v186_v60, %v185_v59  ;;  %v169_v3 = vld [vmem:[#allocation5 + $0x130] sm:$0xff] }
  0x35   :  { %v170_v4 = vld [vmem:[#allocation5 + $0x138] sm:$0xff]  ;;  %v532_v5 = vpack.c.bf16 %v77_v62, %v76_v61  ;;  %v61_v6 = vld [vmem:[#allocation5 + $0x68] sm:$0xff]  ;;  %v187_v7 = vld [vmem:[#allocation5 + $0x1c0] sm:$0xff] }
  0x36   :  { %523 = vmatpush3.bf16.msra.mxu0 %v522_v34  ;;  %547 = vmatpush3.bf16.msra.mxu1 %v546_v51  ;;  %v188_v8 = vld [vmem:[#allocation5 + $0x1c8] sm:$0xff]  ;;  %v78_v9 = vld [vmem:[#allocation5 + $0xf0] sm:$0xff]  ;;  %v79_v10 = vld [vmem:[#allocation5 + $0xf8] sm:$0xff]  ;;  %v554_v11 = vpack.c.bf16 %v170_v4, %v169_v3  ;;  %v534_v12 = vpack.c.bf16 %v61_v6, %v60_v1 }
  0x37   :  { %525 = vmatprep.subr.bf16.mxu0 %v524_v41  ;;  %549 = vmatprep.subr.bf16.mxu1 %v548_v54  ;;  %v62_v13 = vld [vmem:[#allocation5 + $0x70] sm:$0xff]  ;;  %v556_v14 = vpack.c.bf16 %v188_v8, %v187_v7  ;;  %v171_v16 = vld [vmem:[#allocation5 + $0x140] sm:$0xff]  ;;  %v172_v17 = vld [vmem:[#allocation5 + $0x148] sm:$0xff]  ;;  %v536_v18 = vpack.c.bf16 %v79_v10, %v78_v9 }
  0x38   :  { %v63_v19 = vld [vmem:[#allocation5 + $0x78] sm:$0xff]  ;;  %v189_v20 = vld [vmem:[#allocation5 + $0x1d0] sm:$0xff]  ;;  %v558_v23 = vpack.c.bf16 %v172_v17, %v171_v16  ;;  %v191_v30 = vld [vmem:[#allocation5 + $0x1e0] sm:$0xff] }
  0x39   :  { %v190_v21 = vld [vmem:[#allocation5 + $0x1d8] sm:$0xff]  ;;  %v538_v24 = vpack.c.bf16 %v63_v19, %v62_v13  ;;  %v173_v26 = vld [vmem:[#allocation5 + $0x150] sm:$0xff]  ;;  %v192_v32 = vld [vmem:[#allocation5 + $0x1e8] sm:$0xff] }
  0x3a   :  { %527 = vmatpush3.bf16.msra.mxu0 %v526_v52  ;;  %551 = vmatpush3.bf16.msra.mxu1 %v550_v63  ;;  %v560_v25 = vpack.c.bf16 %v190_v21, %v189_v20  ;;  %v174_v27 = vld [vmem:[#allocation5 + $0x158] sm:$0xff]  ;;  %v564_v33 = vpack.c.bf16 %v192_v32, %v191_v30  ;;  %v175_v34 = vld [vmem:[#allocation5 + $0x160] sm:$0xff]  ;;  %v176_v35 = vld [vmem:[#allocation5 + $0x168] sm:$0xff] }
  0x3b   :  { %529 = vmatprep.subr.bf16.mxu0 %v528_v57  ;;  %553 = vmatprep.subr.bf16.mxu1 %v552_v2  ;;  %v562_v29 = vpack.c.bf16 %v174_v27, %v173_v26  ;;  %v566_v36 = vpack.c.bf16 %v176_v35, %v175_v34  ;;  %v193_v37 = vld [vmem:[#allocation5 + $0x1f0] sm:$0xff]  ;;  %v194_v38 = vld [vmem:[#allocation5 + $0x1f8] sm:$0xff]  ;;  %v295_v43 = vld [vmem:[#allocation5 + $0x288] sm:$0xff] }
  0x3c   :  { %v177_v39 = vld [vmem:[#allocation5 + $0x170] sm:$0xff]  ;;  %v568_v40 = vpack.c.bf16 %v194_v38, %v193_v37  ;;  %v178_v41 = vld [vmem:[#allocation5 + $0x178] sm:$0xff]  ;;  %v278_v44 = vld [vmem:[#allocation5 + $0x200] sm:$0xff] }
  0x3d   :  { %v570_v42 = vpack.c.bf16 %v178_v41, %v177_v39  ;;  %v279_v46 = vld [vmem:[#allocation5 + $0x208] sm:$0xff]  ;;  %v296_v47 = vld [vmem:[#allocation5 + $0x290] sm:$0xff]  ;;  %v297_v48 = vld [vmem:[#allocation5 + $0x298] sm:$0xff] }
  0x3e   :  { %531 = vmatpush3.bf16.msra.mxu0 %v530_v0  ;;  %555 = vmatpush3.bf16.msra.mxu1 %v554_v11  ;;  %v574_v49 = vpack.c.bf16 %v279_v46, %v278_v44  ;;  %v576_v50 = vpack.c.bf16 %v297_v48, %v296_v47  ;;  %v280_v51 = vld [vmem:[#allocation5 + $0x210] sm:$0xff]  ;;  %v281_v52 = vld [vmem:[#allocation5 + $0x218] sm:$0xff]  ;;  %v298_v53 = vld [vmem:[#allocation5 + $0x2a0] sm:$0xff]  ;;  %v82_v11 = vsub.s32 0, %v737_v15 }
  0x3f   :  { %533 = vmatprep.subr.bf16.mxu0 %v532_v5  ;;  %557 = vmatprep.subr.bf16.mxu1 %v556_v14  ;;  %v299_v54 = vld [vmem:[#allocation5 + $0x2a8] sm:$0xff]  ;;  %v578_v55 = vpack.c.bf16 %v281_v52, %v280_v51  ;;  %v282_v57 = vld [vmem:[#allocation5 + $0x220] sm:$0xff]  ;;  %v300_v59 = vld [vmem:[#allocation5 + $0x2b0] sm:$0xff] }
  0x40   :  { %v580_v56 = vpack.c.bf16 %v299_v54, %v298_v53  ;;  %v283_v58 = vld [vmem:[#allocation5 + $0x228] sm:$0xff]  ;;  %v301_v60 = vld [vmem:[#allocation5 + $0x2b8] sm:$0xff]  ;;  %v284_v63 = vld [vmem:[#allocation5 + $0x230] sm:$0xff] }
  0x41   :  { %v582_v61 = vpack.c.bf16 %v283_v58, %v282_v57  ;;  %v584_v62 = vpack.c.bf16 %v301_v60, %v300_v59  ;;  %v285_v0 = vld [vmem:[#allocation5 + $0x238] sm:$0xff]  ;;  %v302_v1 = vld [vmem:[#allocation5 + $0x2c0] sm:$0xff]  ;;  %v303_v2 = vld [vmem:[#allocation5 + $0x2c8] sm:$0xff] }
  0x42   :  { %535 = vmatpush3.bf16.msra.mxu0 %v534_v12  ;;  %559 = vmatpush3.bf16.msra.mxu1 %v558_v23  ;;  %v586_v3 = vpack.c.bf16 %v285_v0, %v284_v63  ;;  %v588_v4 = vpack.c.bf16 %v303_v2, %v302_v1  ;;  %v286_v5 = vld [vmem:[#allocation5 + $0x240] sm:$0xff]  ;;  %v287_v6 = vld [vmem:[#allocation5 + $0x248] sm:$0xff]  ;;  %v304_v7 = vld [vmem:[#allocation5 + $0x2d0] sm:$0xff]  ;;  %v83_v12 = vrot.slane %v747_v31, %v82_v11 }
  0x43   :  { %537 = vmatprep.subr.bf16.mxu0 %v536_v18  ;;  %561 = vmatprep.subr.bf16.mxu1 %v560_v25  ;;  %v305_v8 = vld [vmem:[#allocation5 + $0x2d8] sm:$0xff]  ;;  %v590_v9 = vpack.c.bf16 %v287_v6, %v286_v5  ;;  %v288_v23 = vld [vmem:[#allocation5 + $0x250] sm:$0xff]  ;;  %v306_v15 = vld [vmem:[#allocation5 + $0x2e0] sm:$0xff] }
  0x44   :  { %v592_v10 = vpack.c.bf16 %v305_v8, %v304_v7  ;;  %v401_v16 = vld [vmem:[%s777_s2 + $0x2] sm:$0x3]  ;;  %v307_v31 = vld [vmem:[#allocation5 + $0x2e8] sm:$0xff]  ;;  %v290_v27 = vld [vmem:[#allocation5 + $0x260] sm:$0xff] }
  0x45   :  { %v160_v19 = vrot.slane %v401_v16, %v740_v22  ;;  %v596_v26 = vpack.c.bf16 %v307_v31, %v306_v15  ;;  %v308_v32 = vld [vmem:[#allocation5 + $0x2f0] sm:$0xff]  ;;  %v198_v38 = vrot.slane %v401_v16, %v82_v11  ;;  %v402_v41 = vld [vmem:[%s777_s2 + $0x4] sm:$0x3] }
  0x46   :  { %539 = vmatpush3.bf16.msra.mxu0 %v538_v24  ;;  %563 = vmatpush3.bf16.msra.mxu1 %v562_v29  ;;  %v289_v24 = vld [vmem:[#allocation5 + $0x258] sm:$0xff]  ;;  %v291_v29 = vld [vmem:[#allocation5 + $0x268] sm:$0xff]  ;;  %v292_v35 = vld [vmem:[#allocation5 + $0x270] sm:$0xff]  ;;  %v313_v47 = vrot.slane %v402_v41, %v82_v11 }
  0x47   :  { %565 = vmatprep.subr.bf16.mxu1 %v564_v33  ;;  %v594_v25 = vpack.c.bf16 %v289_v24, %v288_v23  ;;  %v598_v30 = vpack.c.bf16 %v291_v29, %v290_v27  ;;  %v309_v33 = vld [vmem:[#allocation5 + $0x2f8] sm:$0xff] }
  0x48   :  { %v600_v34 = vpack.c.bf16 %v309_v33, %v308_v32 }
  0x49   :  { %149 = vmatmul.mubr.f32.vlgmr.msra.gmra.mrb[0].mxu0 %v742_v28  ;;  %v294_v28 = vld [vmem:[#allocation5 + $0x280] sm:$0xff] }
  0x4a   :  { %567 = vmatpush3.bf16.msra.mxu1 %v566_v36  ;;  %v572_v45 = vpack.c.bf16 %v295_v43, %v294_v28  ;;  %v293_v36 = vld [vmem:[#allocation5 + $0x278] sm:$0xff]  ;;  %v275_v43 = vrot.slane %v402_v41, %v740_v22 }
  0x4b   :  { %569 = vmatprep.subr.bf16.mxu1 %v568_v40  ;;  %v602_v37 = vpack.c.bf16 %v293_v36, %v292_v35 }
  0x4c   :  { %573 = vmatprep.subr.bf16.mxu0 %v572_v45 }
  0x4d   :  { %575 = vmatpush3.bf16.msra.mxu0 %v574_v49 }
  0x4e   :  { %571 = vmatpush3.bf16.msra.mxu1 %v570_v42  ;;  %577 = vmatprep.subr.bf16.mxu0 %v576_v50 }
  0x51   :  { %579 = vmatpush3.bf16.msra.mxu0 %v578_v55 }
  0x52   :  { %581 = vmatprep.subr.bf16.mxu0 %v580_v56 }
  0x55   :  { %583 = vmatpush3.bf16.msra.mxu0 %v582_v61 }
  0x56   :  { %585 = vmatprep.subr.bf16.mxu0 %v584_v62 }
  0x59   :  { %587 = vmatpush3.bf16.msra.mxu0 %v586_v3 }
  0x5a   :  { %589 = vmatprep.subr.bf16.mxu0 %v588_v4 }
  0x5d   :  { %591 = vmatpush3.bf16.msra.mxu0 %v590_v9 }
  0x5e   :  { %593 = vmatprep.subr.bf16.mxu0 %v592_v10 }
  0x61   :  { %595 = vmatpush3.bf16.msra.mxu0 %v594_v25 }
  0x62   :  { %597 = vmatprep.subr.bf16.mxu0 %v596_v26 }
  0x65   :  { %599 = vmatpush3.bf16.msra.mxu0 %v598_v30 }
  0x66   :  { %601 = vmatprep.subr.bf16.mxu0 %v600_v34 }
  0x69   :  { %603 = vmatpush3.bf16.msra.mxu0 %v602_v37 }
 0x11c   :  { %v435_v13 = vpop.f32.mrb[0].mxu0 }
 0x11d   :  { %v436_v14 = vpop.f32.mrb[1].mxu0 }
 0x11e   :  { %v437_v17 = vadd.f32 %v436_v14, %v435_v13 }
 0x120   :  { %v151_v18 = vadd.f32 %v437_v17, %v83_v12 }
 0x122   :  { %v154_v20 = vmax.f32 %v151_v18, 0.0 }
 0x124   :  { %v161_v21 = vmul.f32 %v160_v19, %v154_v20 }
 0x126   :  { %263 = vmatprep.mubr.f32.mxu1 %v161_v21 }
 0x127   :  { %264 = vmatmul.mubr.f32.vlgmr.msra.gmra.mrb[0].mxu1 %v154_v20 }
 0x1fa   :  { %v470_v39 = vpop.f32.mrb[0].mxu1 }
 0x1fb   :  { %v471_v40 = vpop.f32.mrb[1].mxu1 }
 0x1fc   :  { %v472_v42 = vadd.f32 %v471_v40, %v470_v39 }
 0x1fe   :  { %v266_v28 = vadd.f32 %v472_v42, %v198_v38 }
 0x200   :  { %v269_v44 = vmax.f32 %v266_v28, 0.0 }
 0x202   :  { %v276_v45 = vmul.f32 %v275_v43, %v269_v44 }
 0x204   :  { %378 = vmatprep.mubr.f32.mxu0 %v276_v45 }
 0x205   :  { %379 = vmatmul.mubr.f32.vlgmr.msra.gmra.mrb[2].mxu0 %v269_v44 }
 0x2d8   :  { %v505_v46 = vpop.f32.mrb[2].mxu0 }
 0x2d9   :  { %v506_v48 = vpop.f32.mrb[3].mxu0 }
 0x2da   :  { %v507_v49 = vadd.f32 %v506_v48, %v505_v46 }
 0x2dc   :  { %v381_v50 = vadd.f32 %v507_v49, %v313_v47 }
 0x2de   :  { %384 = vst [vmem:[#allocation7] sm:$0xff] %v381_v50 }
 0x2df   :  { %664 = shalt.err (!%p661_p6)
}
 0x2e0   :  { %s665_s19 = scalar_lea.hbm %s778_s3, 128 }
 0x2e1   :  { %p666_p7 = scmp.ne.s32.totalorder %s778_s3, %s665_s19  ;;  %p669_p8 = scmp.lt.u32.totalorder %s665_s19, %s778_s3 }
 0x2e3   :  { %p671_p9 = pnand %p669_p8, %p666_p7 }
 0x2e5   :  { %674 = shalt.err (!%p671_p9)
}
 0x2e6   :  { %394 = dma.vmem_to_hbm [thread:$0]  %s392_s16, 128, %s778_s3, [#allocation4]  }
 0x2e7   :  { %679 = dma.done.wait [#allocation4], 128  }
 0x2e8   :  { %680 = vsyncadd [#allocation4], 4294967168 }
 0x2e9   :  { %398 = vsyncpa [#allocation3], 1 }
 0x2ea   :  { %399 = vsyncpa [#allocation6], 1 }
 0x2eb   :  { %400 = vsyncpa [#allocation4], 1 }

</bundles_post_ra>
